<compile_context>
chip_gen: v5e
topology: v5e:2x2
jax: 0.10.0
libtpu: 0.0.40
codegen_flags: <defaults>
</compile_context>

<pallas_src>
import jax
import jax.numpy as jnp
from jax.experimental import pallas as pl
from jax.experimental.pallas import tpu as pltpu


def mean_pool_kernel(x_ref, m_ref, o_ref, acc_ref, cnt_ref):
    # x_ref  : (TB, TS, TH)  hidden-state tile, original dtype (bf16 / f32)
    # m_ref  : (TB, 1, TS)   mask tile, lane-dense along S
    # o_ref  : (TB, 1, TH)   f32 output tile (resident across the S axis)
    # acc_ref: (TB, 1, TH)   f32 accumulator (VMEM scratch)
    # cnt_ref: (TB, 1, 1)    f32 token-count accumulator (VMEM scratch)
    s = pl.program_id(2)

    @pl.when(s == 0)
    def _():
        acc_ref[...] = jnp.zeros_like(acc_ref)
        cnt_ref[...] = jnp.zeros_like(cnt_ref)

    x = x_ref[...]                                   # (TB, TS, TH)
    m = m_ref[...]                                   # (TB, 1, TS)

    # Masked partial sum over this S chunk on the MXU, accumulated in f32.
    # Mask is exactly 0/1, so the bf16 products are exact; accumulation is f32.
    acc_ref[...] += jnp.einsum(
        "bks,bsh->bkh", m.astype(x.dtype), x,
        preferred_element_type=jnp.float32)          # (TB, 1, TH)
    # Number of attended tokens in this chunk (0/1 mask -> exact f32 sum).
    cnt_ref[...] += jnp.sum(m.astype(jnp.float32), axis=-1, keepdims=True)

    @pl.when(s == pl.num_programs(2) - 1)
    def _():
        # torch.clamp(min=1e-9), then one exact divide + TH-wide multiply.
        inv = 1.0 / jnp.maximum(cnt_ref[...], 1e-9)  # (TB, 1, 1)
        o_ref[...] = (acc_ref[...] * inv).astype(o_ref.dtype)


def _choose_tiles(B, S, H, itemsize, budget_bytes):
    """Pick (TB, TS, TH) so one x tile is ~budget_bytes and HBM rows stay long."""
    # Hidden tile: full H whenever the (S, H) slab fits (single contiguous read),
    # or when H is not 128-aligned (only the full dim satisfies the lane rule).
    th = H
    if H % 128 == 0 and S * H * itemsize > budget_bytes:
        divisors = [d * 128 for d in range(H // 128, 0, -1) if H % (d * 128) == 0]
        fitting = [d for d in divisors if d >= 512 and S * d * itemsize <= budget_bytes]
        if fitting:
            th = fitting[0]                            # largest fitting divisor >= 512
        else:
            ge512 = [d for d in divisors if d >= 512]
            th = ge512[-1] if ge512 else divisors[0]   # keep rows wide; split S below

    # Sequence tile: split S (accumulated in scratch) only when the (TS, TH) tile
    # would still exceed the budget.
    ts = S
    if S * th * itemsize > budget_bytes:
        s_divs = [d * 128 for d in range(S // 128, 0, -1) if S % (d * 128) == 0]
        fitting = [d for d in s_divs if d * th * itemsize <= budget_bytes]
        if fitting:
            ts = fitting[0]
        # TODO(synk): very long S that is not a multiple of 128 keeps a full-S tile;
        #             pad S host-side if that ever exceeds VMEM.

    # Batch blocking: grow TB while the x tile stays within the budget (amortises
    # per-grid-step overhead for short-sequence / large-batch shapes).
    tb = 1
    while tb < B and B % (tb * 2) == 0 and (tb * 2) * ts * th * itemsize <= budget_bytes:
        tb *= 2
    # Don't collapse the parallel grid to a single step (v7x has 2 TensorCores).
    while tb > 1 and (B // tb) * (H // th) < 2:
        tb //= 2
    return tb, ts, th


def mean_pooling(last_hidden_state, attention_mask, *, vmem_budget_bytes=4 << 20):
    """Pallas equivalent of MeanPooling.forward (output is float32)."""
    B, S, H = last_hidden_state.shape
    x = last_hidden_state                       # keep original dtype — no HBM round-trip
    m = attention_mask
    if m.dtype == jnp.bool_:
        m = m.astype(jnp.int32)
    m = m.reshape(B, 1, S)                      # metadata-only; S lands on the lane axis

    tb, ts, th = _choose_tiles(B, S, H, jnp.dtype(x.dtype).itemsize, vmem_budget_bytes)
    grid = (B // tb, H // th, S // ts)          # reduction (S) axis innermost

    out = pl.pallas_call(
        mean_pool_kernel,
        out_shape=jax.ShapeDtypeStruct((B, 1, H), jnp.float32),
        grid=grid,
        in_specs=[
            pl.BlockSpec((tb, ts, th), lambda b, h, s: (b, s, h)),
            pl.BlockSpec((tb, 1, ts), lambda b, h, s: (b, 0, s)),
        ],
        out_specs=pl.BlockSpec((tb, 1, th), lambda b, h, s: (b, 0, h)),
        scratch_shapes=[
            pltpu.VMEM((tb, 1, th), jnp.float32),
            pltpu.VMEM((tb, 1, 1), jnp.float32),
        ],
        compiler_params=pltpu.CompilerParams(
            dimension_semantics=("parallel", "parallel", "arbitrary"),
            vmem_limit_bytes=48 << 20,
        ),
    )(x, m)
    return out.reshape(B, H)


def mean_pooling_ref(last_hidden_state, attention_mask):
    """Pure-JAX reference mirroring the PyTorch forward."""
    x = last_hidden_state.astype(jnp.float32)
    m = attention_mask.astype(jnp.float32)[..., None]
    sum_emb = jnp.sum(x * m, axis=1)
    sum_mask = jnp.clip(jnp.sum(m, axis=1), 1e-9, None)
    return sum_emb / sum_mask


if __name__ == "__main__":
    key = jax.random.PRNGKey(0)

    # --- base case: full-H tile, single S step (default budget) ---
    B, S, H = 2, 8, 32
    k1, k2 = jax.random.split(key)
    attention_mask = (jax.random.uniform(k2, (B, S)) > 0.3).astype(jnp.int32)
    attention_mask = attention_mask.at[:, 0].set(1)      # >= 1 attended token per row

    x_f32 = jax.random.normal(k1, (B, S, H), dtype=jnp.float32)
    out_f32 = jax.block_until_ready(mean_pooling(x_f32, attention_mask))
    ref_f32 = mean_pooling_ref(x_f32, attention_mask)
    assert out_f32.shape == (B, H)
    assert jnp.allclose(out_f32, ref_f32, atol=1e-5, rtol=1e-5), "f32 mismatch"

    x_bf16 = x_f32.astype(jnp.bfloat16)
    out_bf16 = jax.block_until_ready(mean_pooling(x_bf16, attention_mask))
    ref_bf16 = mean_pooling_ref(x_bf16, attention_mask)
    assert out_bf16.dtype == jnp.float32
    assert jnp.allclose(out_bf16, ref_bf16, atol=1e-3, rtol=1e-3), "bf16 mismatch"

    # --- exercise the S-split accumulator path (tiny forced budget) ---
    B2, S2, H2 = 4, 256, 256
    k3, k4 = jax.random.split(k1)
    m2 = (jax.random.uniform(k4, (B2, S2)) > 0.5).astype(jnp.int32)
    m2 = m2.at[:, 0].set(1)
    x2 = jax.random.normal(k3, (B2, S2, H2), dtype=jnp.float32)
    out2 = jax.block_until_ready(mean_pooling(x2, m2, vmem_budget_bytes=160 * 1024))
    ref2 = mean_pooling_ref(x2, m2)
    assert jnp.allclose(out2, ref2, atol=1e-4, rtol=1e-4), "S-split mismatch"

    # --- exercise the H-tiling path (th=512 over H=1024) ---
    B3, S3, H3 = 2, 128, 1024
    k5, k6 = jax.random.split(k3)
    m3 = (jax.random.uniform(k6, (B3, S3)) > 0.5).astype(jnp.int32)
    m3 = m3.at[:, 0].set(1)
    x3 = jax.random.normal(k5, (B3, S3, H3), dtype=jnp.bfloat16)
    out3 = jax.block_until_ready(mean_pooling(x3, m3, vmem_budget_bytes=200 * 1024))
    ref3 = mean_pooling_ref(x3, m3)
    assert jnp.allclose(out3, ref3, atol=1e-3, rtol=1e-3), "H-tiling mismatch"

    print("KERNEL_OK")
</pallas_src>

<mosaic_0001>
module attributes {stable_mosaic.version = 11 : i64} {
  func.func @mean_pool_kernel(%arg0: i32, %arg1: i32, %arg2: i32, %arg3: memref<1x8x32xf32, #tpu.memory_space<vmem>>, %arg4: memref<1x1x8xi32, #tpu.memory_space<vmem>>, %arg5: memref<1x1x32xf32, #tpu.memory_space<vmem>>, %arg6: memref<1x1x32xf32, #tpu.memory_space<vmem>>, %arg7: memref<1x1x1xf32, #tpu.memory_space<vmem>>) attributes {dimension_semantics = [#tpu.dimension_semantics<parallel>, #tpu.dimension_semantics<parallel>, #tpu.dimension_semantics<arbitrary>], iteration_bounds = array<i64: 2, 1, 1>, scalar_prefetch = 0 : i64, scratch_operands = 2 : i64, tpu.core_type = #tpu.core_type<tc>, window_params = [{transform_indices = @transform_0, window_bounds = array<i64: 1, 8, 32>}, {transform_indices = @transform_1, window_bounds = array<i64: 1, 1, 8>}, {transform_indices = @transform_2, window_bounds = array<i64: 1, 1, 32>}]} {
    %c0_i32 = arith.constant 0 : i32
    %0 = arith.cmpi eq, %arg2, %c0_i32 : i32
    %1 = arith.extui %0 : i1 to i32
    %c0_i32_0 = arith.constant 0 : i32
    %2 = arith.cmpi ne, %1, %c0_i32_0 : i32
    scf.if %2 {
      %cst_21 = arith.constant 0.000000e+00 : f32
      %19 = vector.broadcast %cst_21 : f32 to vector<1x1x32xf32>
      %c0_22 = arith.constant 0 : index
      %c0_23 = arith.constant 0 : index
      %c0_24 = arith.constant 0 : index
      %20 = vector.load %arg6[%c0_22, %c0_23, %c0_24] : memref<1x1x32xf32, #tpu.memory_space<vmem>>, vector<1x1x32xf32>
      tpu.vector_store %arg6[%c0_22, %c0_23, %c0_24], %19 {strides = array<i32>} : memref<1x1x32xf32, #tpu.memory_space<vmem>>, vector<1x1x32xf32>,
      %cst_25 = arith.constant 0.000000e+00 : f32
      %21 = vector.broadcast %cst_25 : f32 to vector<1x1x1xf32>
      %c0_26 = arith.constant 0 : index
      %c0_27 = arith.constant 0 : index
      %c0_28 = arith.constant 0 : index
      %22 = vector.load %arg7[%c0_26, %c0_27, %c0_28] : memref<1x1x1xf32, #tpu.memory_space<vmem>>, vector<1x1x1xf32>
      tpu.vector_store %arg7[%c0_26, %c0_27, %c0_28], %21 {strides = array<i32>} : memref<1x1x1xf32, #tpu.memory_space<vmem>>, vector<1x1x1xf32>,
    } else {
    }
    %c0 = arith.constant 0 : index
    %c0_1 = arith.constant 0 : index
    %c0_2 = arith.constant 0 : index
    %3 = vector.load %arg3[%c0, %c0_1, %c0_2] : memref<1x8x32xf32, #tpu.memory_space<vmem>>, vector<1x8x32xf32>
    %c0_3 = arith.constant 0 : index
    %c0_4 = arith.constant 0 : index
    %c0_5 = arith.constant 0 : index
    %4 = vector.load %arg4[%c0_3, %c0_4, %c0_5] : memref<1x1x8xi32, #tpu.memory_space<vmem>>, vector<1x1x8xi32>
    %c0_6 = arith.constant 0 : index
    %c0_7 = arith.constant 0 : index
    %c0_8 = arith.constant 0 : index
    %5 = vector.load %arg6[%c0_6, %c0_7, %c0_8] : memref<1x1x32xf32, #tpu.memory_space<vmem>>, vector<1x1x32xf32>
    %6 = arith.sitofp %4 : vector<1x1x8xi32> to vector<1x1x8xf32>
    "tpu.trace_start"() <{level = 10 : i32, message = "bks,bsh->bkh"}> : () -> ()
    %cst = arith.constant dense<0.000000e+00> : vector<1x1x32xf32>
    %7 = tpu.matmul %6, %3, %cst {dimension_numbers = #tpu.dot_dimension_numbers<[2], [1], [1], [2], [0, 0, 0, 1, 1, 2], [0], [0]>} : vector<1x1x8xf32>, vector<1x8x32xf32>, vector<1x1x32xf32> -> vector<1x1x32xf32>
    "tpu.trace_stop"() : () -> ()
    %8 = arith.addf %5, %7 : vector<1x1x32xf32>
    %c0_9 = arith.constant 0 : index
    %c0_10 = arith.constant 0 : index
    %c0_11 = arith.constant 0 : index
    %9 = vector.load %arg6[%c0_9, %c0_10, %c0_11] : memref<1x1x32xf32, #tpu.memory_space<vmem>>, vector<1x1x32xf32>
    tpu.vector_store %arg6[%c0_9, %c0_10, %c0_11], %8 {strides = array<i32>} : memref<1x1x32xf32, #tpu.memory_space<vmem>>, vector<1x1x32xf32>,
    %c0_12 = arith.constant 0 : index
    %c0_13 = arith.constant 0 : index
    %c0_14 = arith.constant 0 : index
    %10 = vector.load %arg7[%c0_12, %c0_13, %c0_14] : memref<1x1x1xf32, #tpu.memory_space<vmem>>, vector<1x1x1xf32>
    %11 = arith.sitofp %4 : vector<1x1x8xi32> to vector<1x1x8xf32>
    %cst_15 = arith.constant dense<0.000000e+00> : vector<1x1xf32>
    %12 = vector.multi_reduction <add>, %11, %cst_15 [2] : vector<1x1x8xf32> to vector<1x1xf32>
    %13 = vector.shape_cast %12 : vector<1x1xf32> to vector<1x1x1xf32>
    %14 = arith.addf %10, %13 : vector<1x1x1xf32>
    %c0_16 = arith.constant 0 : index
    %c0_17 = arith.constant 0 : index
    %c0_18 = arith.constant 0 : index
    %15 = vector.load %arg7[%c0_16, %c0_17, %c0_18] : memref<1x1x1xf32, #tpu.memory_space<vmem>>, vector<1x1x1xf32>
    tpu.vector_store %arg7[%c0_16, %c0_17, %c0_18], %14 {strides = array<i32>} : memref<1x1x1xf32, #tpu.memory_space<vmem>>, vector<1x1x1xf32>,
    %c0_i32_19 = arith.constant 0 : i32
    %16 = arith.cmpi eq, %arg2, %c0_i32_19 : i32
    %17 = arith.extui %16 : i1 to i32
    %c0_i32_20 = arith.constant 0 : i32
    %18 = arith.cmpi ne, %17, %c0_i32_20 : i32
    scf.if %18 {
      %c0_21 = arith.constant 0 : index
      %c0_22 = arith.constant 0 : index
      %c0_23 = arith.constant 0 : index
      %19 = vector.load %arg7[%c0_21, %c0_22, %c0_23] : memref<1x1x1xf32, #tpu.memory_space<vmem>>, vector<1x1x1xf32>
      %cst_24 = arith.constant 9.99999971E-10 : f32
      %20 = vector.broadcast %cst_24 : f32 to vector<1x1x1xf32>
      %21 = arith.maximumf %19, %20 : vector<1x1x1xf32>
      %cst_25 = arith.constant 1.000000e+00 : f32
      %22 = vector.broadcast %cst_25 : f32 to vector<1x1x1xf32>
      %23 = arith.divf %22, %21 : vector<1x1x1xf32>
      %c0_26 = arith.constant 0 : index
      %c0_27 = arith.constant 0 : index
      %c0_28 = arith.constant 0 : index
      %24 = vector.load %arg6[%c0_26, %c0_27, %c0_28] : memref<1x1x32xf32, #tpu.memory_space<vmem>>, vector<1x1x32xf32>
      %25 = vector.broadcast %23 : vector<1x1x1xf32> to vector<1x1x32xf32>
      %26 = arith.mulf %24, %25 : vector<1x1x32xf32>
      %c0_29 = arith.constant 0 : index
      %c0_30 = arith.constant 0 : index
      %c0_31 = arith.constant 0 : index
      %27 = vector.load %arg5[%c0_29, %c0_30, %c0_31] : memref<1x1x32xf32, #tpu.memory_space<vmem>>, vector<1x1x32xf32>
      tpu.vector_store %arg5[%c0_29, %c0_30, %c0_31], %26 {strides = array<i32>} : memref<1x1x32xf32, #tpu.memory_space<vmem>>, vector<1x1x32xf32>,
    } else {
    }
    return
  }
  func.func @transform_0(%arg0: i32, %arg1: i32, %arg2: i32) -> (i32, i32, i32) {
    %c0_i32 = arith.constant 0 : i32
    return %arg0, %arg2, %arg1 : i32, i32, i32
  }
  func.func @transform_1(%arg0: i32, %arg1: i32, %arg2: i32) -> (i32, i32, i32) {
    %c0_i32 = arith.constant 0 : i32
    %c0_i32_0 = arith.constant 0 : i32
    return %arg0, %c0_i32, %arg2 : i32, i32, i32
  }
  func.func @transform_2(%arg0: i32, %arg1: i32, %arg2: i32) -> (i32, i32, i32) {
    %c0_i32 = arith.constant 0 : i32
    %c0_i32_0 = arith.constant 0 : i32
    return %arg0, %c0_i32, %arg1 : i32, i32, i32
  }
}

</mosaic_0001>

<bundles_post_ra>
// kernel: tpu_custom_call.1
= control target key start
LH: loop header
LB: loop body
LE: loop exit
PB: predicated region body
PF: predicated region fallthrough
CT: control target
= control target key end

     0   :  { %7 = vsyncpa [#allocation5], 0  ;;  %s799_s0 = inlined_call_operand.hbm [shape: f32[2,8,32], index: 0, kind: input, shape index: {}]   ;;  %s800_s1 = inlined_call_operand.hbm [shape: s32[2,1,8], index: 1, kind: input, shape index: {}]   ;;  %s801_s2 = inlined_call_operand.hbm [shape: f32[2,1,32], index: 2, kind: output, shape index: {}]  }
   0x1   :  { %9 = vsyncpa [#allocation5 + $0x1], 0 }
   0x2   :  { %10 = vsyncpa [#allocation8], 0 }
   0x3   :  { %12 = vsyncpa [#allocation8 + $0x1], 0 }
   0x4   :  { %13 = vsyncpa [#allocation6], 0 }
   0x5   :  { %15 = vsyncpa [#allocation6 + $0x1], 0  ;;  %s663_s9 = smov 0   ;;  %s665_s10 = smov 0  }
   0x6   :  { %s667_s11 = smov 0   ;;  %s669_s12 = smov 0  }
   0x7   :  { %s671_s13 = smov 0   ;;  %s673_s14 = smov 0  }
   0x8 LB: > { %s415_s15 = sadd.s32 4294967295, %s644_s14   ;;  %s416_s16 = sadd.s32 4294967294, %s644_s14   ;;  %s644_s14 = sphi %s673_s14, %s21_s14   ;;  %s640_s13 = sphi %s671_s13, %s810_s13   ;;  %s636_s12 = sphi %s669_s12, %s809_s12   ;;  %s632_s11 = sphi %s667_s11, %s808_s11   ;;  %s628_s10 = sphi %s665_s10, %s807_s10   ;;  %s624_s9 = sphi %s663_s9, %s806_s9  }
   0x9   : > { %s40_s17 = sadd.s32 1, %s640_s13  ;;  %s51_s18 = sadd.s32 1, %s632_s11 }
   0xa   : > { %p42_p0 = scmp.ge.s32.totalorder %s40_s17, 2  ;;  %p58_p1 = scmp.ne.s32.totalorder %s632_s11, %s628_s10 }
   0xb   : > { %p59_p2 = scmp.eq.s32.totalorder %s644_s14, 0  ;;  %p64_p3 = scmp.ne.s32.totalorder %s628_s10, %s624_s9 }
   0xc   : > { %s812_s17 = smov (%p42_p0, %s40_s17), 0  ;;  %p65_p5 = scmp.eq.s32.totalorder %s415_s15, 0 }
   0xd   : > { %p704_p4 = por %p59_p2, %p58_p1  ;;  %s44_s20 = ssub.s32 %s640_s13, %s812_s17 }
   0xe   : > { %p118_p6 = scmp.eq.s32.totalorder %s415_s15, 1  ;;  %p49_p7 = scmp.eq.s32.totalorder %s44_s20, 0 }
   0xf   : > { %p710_p8 = por %p65_p5, %p64_p3  ;;  %p124_p10 = scmp.eq.s32.totalorder %s416_s16, 1 }
  0x10   : > { %p714_p9 = por %p118_p6, %p58_p1  ;;  %p418_p12 = scmp.ge.s32.totalorder %s644_s14, 2 }
  0x11   : > { %s719_s23 = scalar_select %p49_p7, %s632_s11, %s51_s18  }
  0x12   : > { %p721_p11 = por %p124_p10, %p64_p3  ;;  %p443_p13 = scmp.lt.s32.totalorder %s644_s14, 2 }
  0x13   : > { %s144_s25 = sand.u32 1, %s632_s11   ;;  %s420_s27 = sshll.u32 %s640_s13, 3 }
  0x14   : > { %s419_s26 = sshll.u32 %s144_s25, 3  ;;  %s154_s30 = scalar_lea.hbm %s799_s0, %s420_s27 }
  0x15   : > { %s148_s3 = scalar_lea.vmem [#allocation4], %s419_s26  ;;  %s156_s5 = sshll.u32 %s154_s30, 4  ;;  %s157_s5 = int_to_ptr.hbm [resolvable:$true] %s156_s5 }
  0x16   : > { %s158_s4 = sshll.u32 %s148_s3, 4  ;;  %p433_p0 = pnand %p443_p13, %p704_p4  ;;  %s159_s4 = int_to_ptr.vmem [resolvable:$true] %s158_s4 }
  0x17   : > { %p421_p1 = scmp.ge.s32.totalorder %s644_s14, 1  ;;  %p181_p2 = scmp.lt.s32.totalorder %s644_s14, 3 }
  0x18   : > { %s145_s6 = scalar_lea.sflag [#allocation5], %s144_s25  ;;  %s172_s15 = scalar_lea.hbm %s800_s1, %s640_s13 }
  0x19   : > { %435 = dma.hbm_to_vmem [thread:$0]  (!%p433_p0), %s157_s5, 128, %s159_s4, %s145_s6  }
  0x1a   : > { %p182_p3 = pnand %p421_p1, %p181_p2  ;;  %s168_s16 = scalar_lea.vmem [#allocation7], %s144_s25 }
  0x1b   : > { %s176_s18 = sshll.u32 %s168_s16, 4  ;;  %s174_s20 = sshll.u32 %s172_s15, 4  ;;  %s177_s18 = int_to_ptr.vmem [resolvable:$true] %s176_s18  ;;  %s175_s20 = int_to_ptr.hbm [resolvable:$true] %s174_s20 }
  0x1c   : > { %s166_s26 = scalar_lea.sflag [#allocation8], %s144_s25  ;;  %185 = sbr.rel (%p182_p3) target bundleno = 307 (0x133), region = 28 }
  0x1d   : > { %438 = dma.hbm_to_vmem [thread:$0]  (!%p433_p0), %s175_s20, 16, %s177_s18, %s166_s26  }
  0x1e   : > { %s741_s19 = sand.u32 (!%p182_p3), 1, %s628_s10  }
  0x1f   : > { %s422_s27 = sshll.u32 (!%p182_p3), %s741_s19, 3  ;;  %s188_s28 = scalar_lea.sflag (!%p182_p3), [#allocation5], %s741_s19 }
  0x20   : > { %s191_s29 = scalar_lea.vmem (!%p182_p3), [#allocation4], %s422_s27 }
  0x21   : > { %611 = dma.done.wait (%p710_p8), %s188_s28, 128  }
  0x22   : > { %613 = vsyncadd (%p710_p8), %s188_s28, 4294967168  ;;  %s198_s25 = scalar_lea.sflag [#allocation8], %s741_s19  ;;  %s200_s30 = scalar_lea.vmem [#allocation7], %s741_s19 }
  0x23   : > { %615 = dma.done.wait (%p710_p8), %s198_s25, 16  }
  0x24   : > { %617 = vsyncadd (%p710_p8), %s198_s25, 4294967280  ;;  %vm231_vm0 = vcmask 0   ;;  %v646_v0 = vmov 0.0   ;;  %v234_v1 = vld [vmem:[%s200_s30] sm:$0x1]  ;;  %vm265_vm1 = vcmask 57344   ;;  %s311_s4 = scalar_lea.hbm %s801_s2, %s636_s12 }
  0x25   : > { %232 = vst.msk [vmem:[#allocation3] sm:$0x1] %vm231_vm0, %v646_v0  ;;  %v236_v2 = vcvt.s32.f32 %v234_v1  ;;  %v233_v4 = vld [vmem:[%s191_s29] sm:$0xff]  ;;  %vm237_vm2 = vcmask 64512   ;;  %v647_v5 = vmov 0   ;;  %vm229_vm3 = vcmask 253952  }
  0x26   : > { %256 = vmatpush.msra.mxu0 %v233_v4  ;;  %495 = vset.pattern.permute.xlu0 %v647_v5  ;;  %230 = vst.msk [vmem:[#allocation2] sm:$0x1] %vm229_vm3, %v646_v0  ;;  %s224_s5 = scalar_lea.vmem [#allocation9], %s741_s19  ;;  %s315_s7 = sshll.u32 %s311_s4, 4  ;;  %s316_s7 = int_to_ptr.hbm [resolvable:$true] %s315_s7 }
  0x27   : > { %v266_v3 = vsel %vm265_vm1, %v236_v2, 0.0  ;;  %423 = vmatmul.msk.f32.vlgmr.msra.gmra.mxu0 %vm237_vm2, %v236_v2  ;;  %s313_s6 = sshll.u32 %s224_s5, 4  ;;  %s302_s8 = scalar_lea.sflag [#allocation6], %s741_s19  ;;  %s314_s6 = int_to_ptr.vmem [resolvable:$true] %s313_s6 }
  0x28   : > { %267 = vadd.xlane.f32.xlu0 %v266_v3  ;;  %s572_s15 = sshra.s32 %s316_s7, 4  ;;  %s578_s20 = scalar_lea.hbm %s801_s2, 2  ;;  %s573_s15 = int_to_ptr.hbm [resolvable:$true] %s572_s15 }
  0x29   : > { %s574_s16 = scalar_lea.hbm %s573_s15, 1  ;;  %p579_p7 = scmp.lt.s32.totalorder %s573_s15, %s801_s2 }
  0x2a   : > { %p575_p4 = scmp.ne.s32.totalorder %s573_s15, %s574_s16  ;;  %p580_p8 = scmp.lt.s32.totalorder %s578_s20, %s574_s16 }
  0x2c   : > { %v264_v6 = vld [vmem:[#allocation3] sm:$0x1]  ;;  %p576_p5 = pnand %p575_p4, %p714_p9  ;;  %p581_p10 = por %p580_p8, %p579_p7 }
  0x2d   : > { %v235_v21 = vld [vmem:[#allocation2] sm:$0x1] }
  0x2e   : > { %p577_p6 = pneg %p576_p5 }
  0x30   : > { %p582_p13 = pnand %p581_p10, %p577_p6 }
  0x9b   : > { %v268_v7 = vpop.xlane.xlu0 %267 }
  0x9c   : > { %v269_v8 = vadd.f32 %v268_v7, %v264_v6 }
  0x9e   : > { %271 = vst.msk [vmem:[#allocation3] sm:$0x1] %vm231_vm0, %v269_v8 }
  0xa4   : > { %v258_v22 = vpop.f32.mrf.mxu0 }
  0xa5   : > { %v275_v9 = vld [vmem:[#allocation3] sm:$0x1]  ;;  %v261_v23 = vadd.f32 %v258_v22, %v235_v21 }
  0xa6   : > { %v276_v10 = vmax.f32 %v275_v9, 1e-09 }
  0xa7   : > { %263 = vst.msk [vmem:[#allocation2] sm:$0x1] %vm229_vm3, %v261_v23 }
  0xa8   : > { %496 = vrcp.f32 %v276_v10  ;;  %v288_v14 = vand.u32 2147483648, %v276_v10  ;;  %v286_v16 = vand.u32 2147483647, %v276_v10  ;;  %vm282_vm5 = vweird.f32 %v276_v10 }
  0xaa   : > { %v289_v18 = vor.u32 1.1754944e-38, %v288_v14  ;;  %vm287_vm7 = vcmp.eq.f32.partialorder %v286_v16, 8.507059e+37 }
  0xae   : > { %v497_v11 = vpop.eup %496  ;;  %v292_v25 = vld [vmem:[#allocation2] sm:$0x1] }
  0xaf   : > { %v278_v12 = vmul.f32 %v497_v11, %v276_v10  ;;  %vm283_vm4 = vweird.f32 %v497_v11 }
  0xb0   : > { %vm284_vm6 = vmor %vm282_vm5, %vm283_vm4 }
  0xb1   : > { %v279_v13 = vsub.f32 1.0, %v278_v12 }
  0xb3   : > { %v280_v15 = vmul.f32 %v497_v11, %v279_v13 }
  0xb5   : > { %v281_v17 = vadd.f32 %v497_v11, %v280_v15 }
  0xb7   : > { %v285_v19 = vsel %vm284_vm6, %v497_v11, %v281_v17 }
  0xb8   : > { %v290_v20 = vsel %vm287_vm7, %v289_v18, %v285_v19 }
  0xb9   : > { %295 = vperm.xlu0 %495, %v290_v20  }
 0x12b   : > { %v296_v24 = vpop.permute.xlu0 %295 }
 0x12c   : > { %v298_v26 = vperm.slane %v296_v24, 0 }
 0x12e   : > { %v299_v27 = vmul.f32 %v298_v26, %v292_v25 }
 0x130   : > { %300 = vst.msk [vmem:[%s224_s5] sm:$0x1] %vm229_vm3, %v299_v27 }
 0x131   : > { %585 = shalt.err (!%p582_p13)
}
 0x132   : > { %430 = dma.vmem_to_hbm [thread:$0]  (%p714_p9), %s314_s6, 16, %s316_s7, %s302_s8  }
 0x133 PF: > { %s327_s19 = sand.u32 1, %s624_s9   ;;  %p440_p0 = pnand %p418_p12, %p721_p11 }
 0x134   : > { %s328_s28 = scalar_lea.sflag [#allocation6], %s327_s19 }
 0x135   : > { %p441_p1 = pneg %p440_p0 }
 0x137   : > { %619 = dma.done.wait (%p441_p1), %s328_s28, 16  }
 0x138   : > { %621 = vsyncadd (%p441_p1), %s328_s28, 4294967280  ;;  %s21_s14 = sadd.s32 1, %s644_s14   ;;  %s806_s9 = smov %s628_s10 }
 0x139   : > { %p18_p2 = scmp.ge.s32.totalorder %s21_s14, 4   ;;  %s807_s10 = smov %s632_s11 }
 0x13a   : > { %s808_s11 = smov %s719_s23  ;;  %s809_s12 = smov %s640_s13 }
 0x13b   : > { %s810_s13 = smov %s812_s17  ;;  %20 = sbr.rel (!%p18_p2) target bundleno = 8 (0x8), region = 94 }
 0x140   :  { %333 = vsyncpa [#allocation5], 1 }
 0x141   :  { %335 = vsyncpa [#allocation5 + $0x1], 1 }
 0x142   :  { %336 = vsyncpa [#allocation8], 1 }
 0x143   :  { %338 = vsyncpa [#allocation8 + $0x1], 1 }
 0x144   :  { %339 = vsyncpa [#allocation6], 1 }
 0x145   :  { %341 = vsyncpa [#allocation6 + $0x1], 1 }

</bundles_post_ra>
